<compile_context>
chip_gen: v7x
topology: tpu7x:2x2x1
jax: 0.10.0
libtpu: 0.0.40
codegen_flags: <defaults>
</compile_context>

<pallas_src>
import jax
import jax.numpy as jnp
from jax.experimental import pallas as pl
from jax.experimental.pallas import tpu as pltpu

# Problem sizes (small, consistent with the module: Cin=Cout=3, 3x3 conv)
N, CIN, H, W = 2, 3, 16, 16
COUT, KH, KW = 3, 3, 3
NTAPS = CIN * KH * KW          # 27
NHW = N * H * W                # 512  (multiple of 128 -> lane dense)
LROWS = NHW // 128             # 4 sublane rows of 128 lanes per channel slab


def conv_hswish_kernel(w_ref, b_ref, taps_ref, o_ref):
    # w_ref   : SMEM (COUT*NTAPS,)        flattened conv weights (co-major)
    # b_ref   : SMEM (COUT,)              conv bias
    # taps_ref: VMEM (NTAPS, LROWS, 128)  im2col-lite shifted windows (lane dense)
    # o_ref   : VMEM (COUT, LROWS, 128)   output, one lane-dense slab per channel

    # Accumulators with bias and the epilogue's +5.0 folded into the init
    # (scalar add on the scalar unit, not a full-tile VALU op).
    accs = [jnp.full((LROWS, 128), b_ref[co] + 5.0, dtype=jnp.float32)
            for co in range(COUT)]

    # Tap accumulation on full, aligned vreg rows. Each tap is loaded once and
    # reused for all 3 output channels; weights are read just-in-time from SMEM.
    for t in range(NTAPS):
        tap = taps_ref[t]                      # (LROWS, 128), aligned
        for co in range(COUT):
            accs[co] = accs[co] + tap * w_ref[co * NTAPS + t]

    # Per-channel fused epilogue + direct unmasked store (no stack/concat).
    for co in range(COUT):
        v3 = jnp.clip(accs[co], 0.0, 6.0)
        v5 = jnp.maximum(v3 - 3.0, 0.0)        # upper clamp to 6 is redundant
        o_ref[co] = v3 * v5 * (1.0 / 6.0)


def model_forward(x, weight, bias):
    """x: (N, CIN, H, W) f32; weight: (COUT, CIN, KH, KW); bias: (COUT,)."""
    x = x.astype(jnp.float32)
    xp = jnp.pad(x, ((0, 0), (0, 0), (1, 1), (1, 1)))  # zero-pad H, W by 1

    # im2col-lite: 27 shifted windows, each flattened to a lane-dense
    # (LROWS, 128) slab. Done in XLA on a few-KB tensor (preprocessing).
    taps = []
    for ci in range(CIN):
        for kh in range(KH):
            for kw in range(KW):
                taps.append(
                    xp[:, ci, kh:kh + H, kw:kw + W].reshape(LROWS, 128))
    taps = jnp.stack(taps, axis=0)                       # (27, LROWS, 128)

    w_flat = weight.reshape(-1).astype(jnp.float32)      # (COUT*NTAPS,), co-major
    b = bias.astype(jnp.float32)

    # Single invocation, no grid: everything resident in VMEM/SMEM.
    out = pl.pallas_call(
        conv_hswish_kernel,
        out_shape=jax.ShapeDtypeStruct((COUT, LROWS, 128), jnp.float32),
        in_specs=[
            pl.BlockSpec(memory_space=pltpu.MemorySpace.SMEM),   # weights
            pl.BlockSpec(memory_space=pltpu.MemorySpace.SMEM),   # bias
            pl.BlockSpec(memory_space=pltpu.MemorySpace.VMEM),   # taps
        ],
        out_specs=pl.BlockSpec(memory_space=pltpu.MemorySpace.VMEM),
    )(w_flat, b, taps)

    # (COUT, LROWS, 128) -> (COUT, N, H, W) -> (N, COUT, H, W); 6 KB, negligible.
    return out.reshape(COUT, N, H, W).transpose(1, 0, 2, 3)


def reference_forward(x, weight, bias):
    v1 = jax.lax.conv_general_dilated(
        x, weight, window_strides=(1, 1), padding=((1, 1), (1, 1)),
        dimension_numbers=("NCHW", "OIHW", "NCHW"))
    v1 = v1 + bias.reshape(1, COUT, 1, 1)
    v2 = 5.0 + v1
    v3 = jnp.clip(v2, 0.0, 6.0)
    v5 = jnp.clip(v3 - 3.0, 0.0, 6.0)
    return v3 * v5 / 6.0


if __name__ == "__main__":
    key = jax.random.PRNGKey(0)
    kx, kw, kb = jax.random.split(key, 3)

    # deterministic parameter init (PyTorch-style uniform(-1/sqrt(fan_in), ...))
    fan_in = CIN * KH * KW
    bound = 1.0 / jnp.sqrt(float(fan_in))
    weight = jax.random.uniform(kw, (COUT, CIN, KH, KW),
                                minval=-bound, maxval=bound, dtype=jnp.float32)
    bias = jax.random.uniform(kb, (COUT,),
                              minval=-bound, maxval=bound, dtype=jnp.float32)

    x = jax.random.normal(kx, (N, CIN, H, W), dtype=jnp.float32)

    out = model_forward(x, weight, bias)
    out = jax.block_until_ready(out)

    ref = reference_forward(x, weight, bias)
    assert out.shape == (N, COUT, H, W)
    assert jnp.allclose(out, ref, atol=1e-5, rtol=1e-5), "mismatch vs reference"

    print("KERNEL_OK")
</pallas_src>

<mosaic_0001>
module attributes {stable_mosaic.version = 11 : i64} {
  func.func @conv_hswish_kernel(%arg0: memref<81xf32, #tpu.memory_space<smem>>, %arg1: memref<3xf32, #tpu.memory_space<smem>>, %arg2: memref<27x4x128xf32, #tpu.memory_space<vmem>>, %arg3: memref<3x4x128xf32, #tpu.memory_space<vmem>>) attributes {dimension_semantics = [], scalar_prefetch = 0 : i64, scratch_operands = 0 : i64, tpu.core_type = #tpu.core_type<tc>} {
    %c0 = arith.constant 0 : index
    %0 = memref.load %arg1[%c0] : memref<3xf32, #tpu.memory_space<smem>>
    %cst = arith.constant 5.000000e+00 : f32
    %1 = arith.addf %0, %cst : f32
    %2 = vector.broadcast %1 : f32 to vector<4x128xf32>
    %c1 = arith.constant 1 : index
    %3 = memref.load %arg1[%c1] : memref<3xf32, #tpu.memory_space<smem>>
    %cst_0 = arith.constant 5.000000e+00 : f32
    %4 = arith.addf %3, %cst_0 : f32
    %5 = vector.broadcast %4 : f32 to vector<4x128xf32>
    %c2 = arith.constant 2 : index
    %6 = memref.load %arg1[%c2] : memref<3xf32, #tpu.memory_space<smem>>
    %cst_1 = arith.constant 5.000000e+00 : f32
    %7 = arith.addf %6, %cst_1 : f32
    %8 = vector.broadcast %7 : f32 to vector<4x128xf32>
    %c0_2 = arith.constant 0 : index
    %c0_3 = arith.constant 0 : index
    %c0_4 = arith.constant 0 : index
    %9 = vector.load %arg2[%c0_2, %c0_3, %c0_4] : memref<27x4x128xf32, #tpu.memory_space<vmem>>, vector<1x4x128xf32>
    %10 = vector.shape_cast %9 : vector<1x4x128xf32> to vector<4x128xf32>
    %c0_5 = arith.constant 0 : index
    %11 = memref.load %arg0[%c0_5] : memref<81xf32, #tpu.memory_space<smem>>
    %12 = vector.broadcast %11 : f32 to vector<4x128xf32>
    %13 = arith.mulf %10, %12 : vector<4x128xf32>
    %14 = arith.addf %2, %13 : vector<4x128xf32>
    %c27 = arith.constant 27 : index
    %15 = memref.load %arg0[%c27] : memref<81xf32, #tpu.memory_space<smem>>
    %16 = vector.broadcast %15 : f32 to vector<4x128xf32>
    %17 = arith.mulf %10, %16 : vector<4x128xf32>
    %18 = arith.addf %5, %17 : vector<4x128xf32>
    %c54 = arith.constant 54 : index
    %19 = memref.load %arg0[%c54] : memref<81xf32, #tpu.memory_space<smem>>
    %20 = vector.broadcast %19 : f32 to vector<4x128xf32>
    %21 = arith.mulf %10, %20 : vector<4x128xf32>
    %22 = arith.addf %8, %21 : vector<4x128xf32>
    %c1_6 = arith.constant 1 : index
    %c0_7 = arith.constant 0 : index
    %c0_8 = arith.constant 0 : index
    %23 = vector.load %arg2[%c1_6, %c0_7, %c0_8] : memref<27x4x128xf32, #tpu.memory_space<vmem>>, vector<1x4x128xf32>
    %24 = vector.shape_cast %23 : vector<1x4x128xf32> to vector<4x128xf32>
    %c1_9 = arith.constant 1 : index
    %25 = memref.load %arg0[%c1_9] : memref<81xf32, #tpu.memory_space<smem>>
    %26 = vector.broadcast %25 : f32 to vector<4x128xf32>
    %27 = arith.mulf %24, %26 : vector<4x128xf32>
    %28 = arith.addf %14, %27 : vector<4x128xf32>
    %c28 = arith.constant 28 : index
    %29 = memref.load %arg0[%c28] : memref<81xf32, #tpu.memory_space<smem>>
    %30 = vector.broadcast %29 : f32 to vector<4x128xf32>
    %31 = arith.mulf %24, %30 : vector<4x128xf32>
    %32 = arith.addf %18, %31 : vector<4x128xf32>
    %c55 = arith.constant 55 : index
    %33 = memref.load %arg0[%c55] : memref<81xf32, #tpu.memory_space<smem>>
    %34 = vector.broadcast %33 : f32 to vector<4x128xf32>
    %35 = arith.mulf %24, %34 : vector<4x128xf32>
    %36 = arith.addf %22, %35 : vector<4x128xf32>
    %c2_10 = arith.constant 2 : index
    %c0_11 = arith.constant 0 : index
    %c0_12 = arith.constant 0 : index
    %37 = vector.load %arg2[%c2_10, %c0_11, %c0_12] : memref<27x4x128xf32, #tpu.memory_space<vmem>>, vector<1x4x128xf32>
    %38 = vector.shape_cast %37 : vector<1x4x128xf32> to vector<4x128xf32>
    %c2_13 = arith.constant 2 : index
    %39 = memref.load %arg0[%c2_13] : memref<81xf32, #tpu.memory_space<smem>>
    %40 = vector.broadcast %39 : f32 to vector<4x128xf32>
    %41 = arith.mulf %38, %40 : vector<4x128xf32>
    %42 = arith.addf %28, %41 : vector<4x128xf32>
    %c29 = arith.constant 29 : index
    %43 = memref.load %arg0[%c29] : memref<81xf32, #tpu.memory_space<smem>>
    %44 = vector.broadcast %43 : f32 to vector<4x128xf32>
    %45 = arith.mulf %38, %44 : vector<4x128xf32>
    %46 = arith.addf %32, %45 : vector<4x128xf32>
    %c56 = arith.constant 56 : index
    %47 = memref.load %arg0[%c56] : memref<81xf32, #tpu.memory_space<smem>>
    %48 = vector.broadcast %47 : f32 to vector<4x128xf32>
    %49 = arith.mulf %38, %48 : vector<4x128xf32>
    %50 = arith.addf %36, %49 : vector<4x128xf32>
    %c3 = arith.constant 3 : index
    %c0_14 = arith.constant 0 : index
    %c0_15 = arith.constant 0 : index
    %51 = vector.load %arg2[%c3, %c0_14, %c0_15] : memref<27x4x128xf32, #tpu.memory_space<vmem>>, vector<1x4x128xf32>
    %52 = vector.shape_cast %51 : vector<1x4x128xf32> to vector<4x128xf32>
    %c3_16 = arith.constant 3 : index
    %53 = memref.load %arg0[%c3_16] : memref<81xf32, #tpu.memory_space<smem>>
    %54 = vector.broadcast %53 : f32 to vector<4x128xf32>
    %55 = arith.mulf %52, %54 : vector<4x128xf32>
    %56 = arith.addf %42, %55 : vector<4x128xf32>
    %c30 = arith.constant 30 : index
    %57 = memref.load %arg0[%c30] : memref<81xf32, #tpu.memory_space<smem>>
    %58 = vector.broadcast %57 : f32 to vector<4x128xf32>
    %59 = arith.mulf %52, %58 : vector<4x128xf32>
    %60 = arith.addf %46, %59 : vector<4x128xf32>
    %c57 = arith.constant 57 : index
    %61 = memref.load %arg0[%c57] : memref<81xf32, #tpu.memory_space<smem>>
    %62 = vector.broadcast %61 : f32 to vector<4x128xf32>
    %63 = arith.mulf %52, %62 : vector<4x128xf32>
    %64 = arith.addf %50, %63 : vector<4x128xf32>
    %c4 = arith.constant 4 : index
    %c0_17 = arith.constant 0 : index
    %c0_18 = arith.constant 0 : index
    %65 = vector.load %arg2[%c4, %c0_17, %c0_18] : memref<27x4x128xf32, #tpu.memory_space<vmem>>, vector<1x4x128xf32>
    %66 = vector.shape_cast %65 : vector<1x4x128xf32> to vector<4x128xf32>
    %c4_19 = arith.constant 4 : index
    %67 = memref.load %arg0[%c4_19] : memref<81xf32, #tpu.memory_space<smem>>
    %68 = vector.broadcast %67 : f32 to vector<4x128xf32>
    %69 = arith.mulf %66, %68 : vector<4x128xf32>
    %70 = arith.addf %56, %69 : vector<4x128xf32>
    %c31 = arith.constant 31 : index
    %71 = memref.load %arg0[%c31] : memref<81xf32, #tpu.memory_space<smem>>
    %72 = vector.broadcast %71 : f32 to vector<4x128xf32>
    %73 = arith.mulf %66, %72 : vector<4x128xf32>
    %74 = arith.addf %60, %73 : vector<4x128xf32>
    %c58 = arith.constant 58 : index
    %75 = memref.load %arg0[%c58] : memref<81xf32, #tpu.memory_space<smem>>
    %76 = vector.broadcast %75 : f32 to vector<4x128xf32>
    %77 = arith.mulf %66, %76 : vector<4x128xf32>
    %78 = arith.addf %64, %77 : vector<4x128xf32>
    %c5 = arith.constant 5 : index
    %c0_20 = arith.constant 0 : index
    %c0_21 = arith.constant 0 : index
    %79 = vector.load %arg2[%c5, %c0_20, %c0_21] : memref<27x4x128xf32, #tpu.memory_space<vmem>>, vector<1x4x128xf32>
    %80 = vector.shape_cast %79 : vector<1x4x128xf32> to vector<4x128xf32>
    %c5_22 = arith.constant 5 : index
    %81 = memref.load %arg0[%c5_22] : memref<81xf32, #tpu.memory_space<smem>>
    %82 = vector.broadcast %81 : f32 to vector<4x128xf32>
    %83 = arith.mulf %80, %82 : vector<4x128xf32>
    %84 = arith.addf %70, %83 : vector<4x128xf32>
    %c32 = arith.constant 32 : index
    %85 = memref.load %arg0[%c32] : memref<81xf32, #tpu.memory_space<smem>>
    %86 = vector.broadcast %85 : f32 to vector<4x128xf32>
    %87 = arith.mulf %80, %86 : vector<4x128xf32>
    %88 = arith.addf %74, %87 : vector<4x128xf32>
    %c59 = arith.constant 59 : index
    %89 = memref.load %arg0[%c59] : memref<81xf32, #tpu.memory_space<smem>>
    %90 = vector.broadcast %89 : f32 to vector<4x128xf32>
    %91 = arith.mulf %80, %90 : vector<4x128xf32>
    %92 = arith.addf %78, %91 : vector<4x128xf32>
    %c6 = arith.constant 6 : index
    %c0_23 = arith.constant 0 : index
    %c0_24 = arith.constant 0 : index
    %93 = vector.load %arg2[%c6, %c0_23, %c0_24] : memref<27x4x128xf32, #tpu.memory_space<vmem>>, vector<1x4x128xf32>
    %94 = vector.shape_cast %93 : vector<1x4x128xf32> to vector<4x128xf32>
    %c6_25 = arith.constant 6 : index
    %95 = memref.load %arg0[%c6_25] : memref<81xf32, #tpu.memory_space<smem>>
    %96 = vector.broadcast %95 : f32 to vector<4x128xf32>
    %97 = arith.mulf %94, %96 : vector<4x128xf32>
    %98 = arith.addf %84, %97 : vector<4x128xf32>
    %c33 = arith.constant 33 : index
    %99 = memref.load %arg0[%c33] : memref<81xf32, #tpu.memory_space<smem>>
    %100 = vector.broadcast %99 : f32 to vector<4x128xf32>
    %101 = arith.mulf %94, %100 : vector<4x128xf32>
    %102 = arith.addf %88, %101 : vector<4x128xf32>
    %c60 = arith.constant 60 : index
    %103 = memref.load %arg0[%c60] : memref<81xf32, #tpu.memory_space<smem>>
    %104 = vector.broadcast %103 : f32 to vector<4x128xf32>
    %105 = arith.mulf %94, %104 : vector<4x128xf32>
    %106 = arith.addf %92, %105 : vector<4x128xf32>
    %c7 = arith.constant 7 : index
    %c0_26 = arith.constant 0 : index
    %c0_27 = arith.constant 0 : index
    %107 = vector.load %arg2[%c7, %c0_26, %c0_27] : memref<27x4x128xf32, #tpu.memory_space<vmem>>, vector<1x4x128xf32>
    %108 = vector.shape_cast %107 : vector<1x4x128xf32> to vector<4x128xf32>
    %c7_28 = arith.constant 7 : index
    %109 = memref.load %arg0[%c7_28] : memref<81xf32, #tpu.memory_space<smem>>
    %110 = vector.broadcast %109 : f32 to vector<4x128xf32>
    %111 = arith.mulf %108, %110 : vector<4x128xf32>
    %112 = arith.addf %98, %111 : vector<4x128xf32>
    %c34 = arith.constant 34 : index
    %113 = memref.load %arg0[%c34] : memref<81xf32, #tpu.memory_space<smem>>
    %114 = vector.broadcast %113 : f32 to vector<4x128xf32>
    %115 = arith.mulf %108, %114 : vector<4x128xf32>
    %116 = arith.addf %102, %115 : vector<4x128xf32>
    %c61 = arith.constant 61 : index
    %117 = memref.load %arg0[%c61] : memref<81xf32, #tpu.memory_space<smem>>
    %118 = vector.broadcast %117 : f32 to vector<4x128xf32>
    %119 = arith.mulf %108, %118 : vector<4x128xf32>
    %120 = arith.addf %106, %119 : vector<4x128xf32>
    %c8 = arith.constant 8 : index
    %c0_29 = arith.constant 0 : index
    %c0_30 = arith.constant 0 : index
    %121 = vector.load %arg2[%c8, %c0_29, %c0_30] : memref<27x4x128xf32, #tpu.memory_space<vmem>>, vector<1x4x128xf32>
    %122 = vector.shape_cast %121 : vector<1x4x128xf32> to vector<4x128xf32>
    %c8_31 = arith.constant 8 : index
    %123 = memref.load %arg0[%c8_31] : memref<81xf32, #tpu.memory_space<smem>>
    %124 = vector.broadcast %123 : f32 to vector<4x128xf32>
    %125 = arith.mulf %122, %124 : vector<4x128xf32>
    %126 = arith.addf %112, %125 : vector<4x128xf32>
    %c35 = arith.constant 35 : index
    %127 = memref.load %arg0[%c35] : memref<81xf32, #tpu.memory_space<smem>>
    %128 = vector.broadcast %127 : f32 to vector<4x128xf32>
    %129 = arith.mulf %122, %128 : vector<4x128xf32>
    %130 = arith.addf %116, %129 : vector<4x128xf32>
    %c62 = arith.constant 62 : index
    %131 = memref.load %arg0[%c62] : memref<81xf32, #tpu.memory_space<smem>>
    %132 = vector.broadcast %131 : f32 to vector<4x128xf32>
    %133 = arith.mulf %122, %132 : vector<4x128xf32>
    %134 = arith.addf %120, %133 : vector<4x128xf32>
    %c9 = arith.constant 9 : index
    %c0_32 = arith.constant 0 : index
    %c0_33 = arith.constant 0 : index
    %135 = vector.load %arg2[%c9, %c0_32, %c0_33] : memref<27x4x128xf32, #tpu.memory_space<vmem>>, vector<1x4x128xf32>
    %136 = vector.shape_cast %135 : vector<1x4x128xf32> to vector<4x128xf32>
    %c9_34 = arith.constant 9 : index
    %137 = memref.load %arg0[%c9_34] : memref<81xf32, #tpu.memory_space<smem>>
    %138 = vector.broadcast %137 : f32 to vector<4x128xf32>
    %139 = arith.mulf %136, %138 : vector<4x128xf32>
    %140 = arith.addf %126, %139 : vector<4x128xf32>
    %c36 = arith.constant 36 : index
    %141 = memref.load %arg0[%c36] : memref<81xf32, #tpu.memory_space<smem>>
    %142 = vector.broadcast %141 : f32 to vector<4x128xf32>
    %143 = arith.mulf %136, %142 : vector<4x128xf32>
    %144 = arith.addf %130, %143 : vector<4x128xf32>
    %c63 = arith.constant 63 : index
    %145 = memref.load %arg0[%c63] : memref<81xf32, #tpu.memory_space<smem>>
    %146 = vector.broadcast %145 : f32 to vector<4x128xf32>
    %147 = arith.mulf %136, %146 : vector<4x128xf32>
    %148 = arith.addf %134, %147 : vector<4x128xf32>
    %c10 = arith.constant 10 : index
    %c0_35 = arith.constant 0 : index
    %c0_36 = arith.constant 0 : index
    %149 = vector.load %arg2[%c10, %c0_35, %c0_36] : memref<27x4x128xf32, #tpu.memory_space<vmem>>, vector<1x4x128xf32>
    %150 = vector.shape_cast %149 : vector<1x4x128xf32> to vector<4x128xf32>
    %c10_37 = arith.constant 10 : index
    %151 = memref.load %arg0[%c10_37] : memref<81xf32, #tpu.memory_space<smem>>
    %152 = vector.broadcast %151 : f32 to vector<4x128xf32>
    %153 = arith.mulf %150, %152 : vector<4x128xf32>
    %154 = arith.addf %140, %153 : vector<4x128xf32>
    %c37 = arith.constant 37 : index
    %155 = memref.load %arg0[%c37] : memref<81xf32, #tpu.memory_space<smem>>
    %156 = vector.broadcast %155 : f32 to vector<4x128xf32>
    %157 = arith.mulf %150, %156 : vector<4x128xf32>
    %158 = arith.addf %144, %157 : vector<4x128xf32>
    %c64 = arith.constant 64 : index
    %159 = memref.load %arg0[%c64] : memref<81xf32, #tpu.memory_space<smem>>
    %160 = vector.broadcast %159 : f32 to vector<4x128xf32>
    %161 = arith.mulf %150, %160 : vector<4x128xf32>
    %162 = arith.addf %148, %161 : vector<4x128xf32>
    %c11 = arith.constant 11 : index
    %c0_38 = arith.constant 0 : index
    %c0_39 = arith.constant 0 : index
    %163 = vector.load %arg2[%c11, %c0_38, %c0_39] : memref<27x4x128xf32, #tpu.memory_space<vmem>>, vector<1x4x128xf32>
    %164 = vector.shape_cast %163 : vector<1x4x128xf32> to vector<4x128xf32>
    %c11_40 = arith.constant 11 : index
    %165 = memref.load %arg0[%c11_40] : memref<81xf32, #tpu.memory_space<smem>>
    %166 = vector.broadcast %165 : f32 to vector<4x128xf32>
    %167 = arith.mulf %164, %166 : vector<4x128xf32>
    %168 = arith.addf %154, %167 : vector<4x128xf32>
    %c38 = arith.constant 38 : index
    %169 = memref.load %arg0[%c38] : memref<81xf32, #tpu.memory_space<smem>>
    %170 = vector.broadcast %169 : f32 to vector<4x128xf32>
    %171 = arith.mulf %164, %170 : vector<4x128xf32>
    %172 = arith.addf %158, %171 : vector<4x128xf32>
    %c65 = arith.constant 65 : index
    %173 = memref.load %arg0[%c65] : memref<81xf32, #tpu.memory_space<smem>>
    %174 = vector.broadcast %173 : f32 to vector<4x128xf32>
    %175 = arith.mulf %164, %174 : vector<4x128xf32>
    %176 = arith.addf %162, %175 : vector<4x128xf32>
    %c12 = arith.constant 12 : index
    %c0_41 = arith.constant 0 : index
    %c0_42 = arith.constant 0 : index
    %177 = vector.load %arg2[%c12, %c0_41, %c0_42] : memref<27x4x128xf32, #tpu.memory_space<vmem>>, vector<1x4x128xf32>
    %178 = vector.shape_cast %177 : vector<1x4x128xf32> to vector<4x128xf32>
    %c12_43 = arith.constant 12 : index
    %179 = memref.load %arg0[%c12_43] : memref<81xf32, #tpu.memory_space<smem>>
    %180 = vector.broadcast %179 : f32 to vector<4x128xf32>
    %181 = arith.mulf %178, %180 : vector<4x128xf32>
    %182 = arith.addf %168, %181 : vector<4x128xf32>
    %c39 = arith.constant 39 : index
    %183 = memref.load %arg0[%c39] : memref<81xf32, #tpu.memory_space<smem>>
    %184 = vector.broadcast %183 : f32 to vector<4x128xf32>
    %185 = arith.mulf %178, %184 : vector<4x128xf32>
    %186 = arith.addf %172, %185 : vector<4x128xf32>
    %c66 = arith.constant 66 : index
    %187 = memref.load %arg0[%c66] : memref<81xf32, #tpu.memory_space<smem>>
    %188 = vector.broadcast %187 : f32 to vector<4x128xf32>
    %189 = arith.mulf %178, %188 : vector<4x128xf32>
    %190 = arith.addf %176, %189 : vector<4x128xf32>
    %c13 = arith.constant 13 : index
    %c0_44 = arith.constant 0 : index
    %c0_45 = arith.constant 0 : index
    %191 = vector.load %arg2[%c13, %c0_44, %c0_45] : memref<27x4x128xf32, #tpu.memory_space<vmem>>, vector<1x4x128xf32>
    %192 = vector.shape_cast %191 : vector<1x4x128xf32> to vector<4x128xf32>
    %c13_46 = arith.constant 13 : index
    %193 = memref.load %arg0[%c13_46] : memref<81xf32, #tpu.memory_space<smem>>
    %194 = vector.broadcast %193 : f32 to vector<4x128xf32>
    %195 = arith.mulf %192, %194 : vector<4x128xf32>
    %196 = arith.addf %182, %195 : vector<4x128xf32>
    %c40 = arith.constant 40 : index
    %197 = memref.load %arg0[%c40] : memref<81xf32, #tpu.memory_space<smem>>
    %198 = vector.broadcast %197 : f32 to vector<4x128xf32>
    %199 = arith.mulf %192, %198 : vector<4x128xf32>
    %200 = arith.addf %186, %199 : vector<4x128xf32>
    %c67 = arith.constant 67 : index
    %201 = memref.load %arg0[%c67] : memref<81xf32, #tpu.memory_space<smem>>
    %202 = vector.broadcast %201 : f32 to vector<4x128xf32>
    %203 = arith.mulf %192, %202 : vector<4x128xf32>
    %204 = arith.addf %190, %203 : vector<4x128xf32>
    %c14 = arith.constant 14 : index
    %c0_47 = arith.constant 0 : index
    %c0_48 = arith.constant 0 : index
    %205 = vector.load %arg2[%c14, %c0_47, %c0_48] : memref<27x4x128xf32, #tpu.memory_space<vmem>>, vector<1x4x128xf32>
    %206 = vector.shape_cast %205 : vector<1x4x128xf32> to vector<4x128xf32>
    %c14_49 = arith.constant 14 : index
    %207 = memref.load %arg0[%c14_49] : memref<81xf32, #tpu.memory_space<smem>>
    %208 = vector.broadcast %207 : f32 to vector<4x128xf32>
    %209 = arith.mulf %206, %208 : vector<4x128xf32>
    %210 = arith.addf %196, %209 : vector<4x128xf32>
    %c41 = arith.constant 41 : index
    %211 = memref.load %arg0[%c41] : memref<81xf32, #tpu.memory_space<smem>>
    %212 = vector.broadcast %211 : f32 to vector<4x128xf32>
    %213 = arith.mulf %206, %212 : vector<4x128xf32>
    %214 = arith.addf %200, %213 : vector<4x128xf32>
    %c68 = arith.constant 68 : index
    %215 = memref.load %arg0[%c68] : memref<81xf32, #tpu.memory_space<smem>>
    %216 = vector.broadcast %215 : f32 to vector<4x128xf32>
    %217 = arith.mulf %206, %216 : vector<4x128xf32>
    %218 = arith.addf %204, %217 : vector<4x128xf32>
    %c15 = arith.constant 15 : index
    %c0_50 = arith.constant 0 : index
    %c0_51 = arith.constant 0 : index
    %219 = vector.load %arg2[%c15, %c0_50, %c0_51] : memref<27x4x128xf32, #tpu.memory_space<vmem>>, vector<1x4x128xf32>
    %220 = vector.shape_cast %219 : vector<1x4x128xf32> to vector<4x128xf32>
    %c15_52 = arith.constant 15 : index
    %221 = memref.load %arg0[%c15_52] : memref<81xf32, #tpu.memory_space<smem>>
    %222 = vector.broadcast %221 : f32 to vector<4x128xf32>
    %223 = arith.mulf %220, %222 : vector<4x128xf32>
    %224 = arith.addf %210, %223 : vector<4x128xf32>
    %c42 = arith.constant 42 : index
    %225 = memref.load %arg0[%c42] : memref<81xf32, #tpu.memory_space<smem>>
    %226 = vector.broadcast %225 : f32 to vector<4x128xf32>
    %227 = arith.mulf %220, %226 : vector<4x128xf32>
    %228 = arith.addf %214, %227 : vector<4x128xf32>
    %c69 = arith.constant 69 : index
    %229 = memref.load %arg0[%c69] : memref<81xf32, #tpu.memory_space<smem>>
    %230 = vector.broadcast %229 : f32 to vector<4x128xf32>
    %231 = arith.mulf %220, %230 : vector<4x128xf32>
    %232 = arith.addf %218, %231 : vector<4x128xf32>
    %c16 = arith.constant 16 : index
    %c0_53 = arith.constant 0 : index
    %c0_54 = arith.constant 0 : index
    %233 = vector.load %arg2[%c16, %c0_53, %c0_54] : memref<27x4x128xf32, #tpu.memory_space<vmem>>, vector<1x4x128xf32>
    %234 = vector.shape_cast %233 : vector<1x4x128xf32> to vector<4x128xf32>
    %c16_55 = arith.constant 16 : index
    %235 = memref.load %arg0[%c16_55] : memref<81xf32, #tpu.memory_space<smem>>
    %236 = vector.broadcast %235 : f32 to vector<4x128xf32>
    %237 = arith.mulf %234, %236 : vector<4x128xf32>
    %238 = arith.addf %224, %237 : vector<4x128xf32>
    %c43 = arith.constant 43 : index
    %239 = memref.load %arg0[%c43] : memref<81xf32, #tpu.memory_space<smem>>
    %240 = vector.broadcast %239 : f32 to vector<4x128xf32>
    %241 = arith.mulf %234, %240 : vector<4x128xf32>
    %242 = arith.addf %228, %241 : vector<4x128xf32>
    %c70 = arith.constant 70 : index
    %243 = memref.load %arg0[%c70] : memref<81xf32, #tpu.memory_space<smem>>
    %244 = vector.broadcast %243 : f32 to vector<4x128xf32>
    %245 = arith.mulf %234, %244 : vector<4x128xf32>
    %246 = arith.addf %232, %245 : vector<4x128xf32>
    %c17 = arith.constant 17 : index
    %c0_56 = arith.constant 0 : index
    %c0_57 = arith.constant 0 : index
    %247 = vector.load %arg2[%c17, %c0_56, %c0_57] : memref<27x4x128xf32, #tpu.memory_space<vmem>>, vector<1x4x128xf32>
    %248 = vector.shape_cast %247 : vector<1x4x128xf32> to vector<4x128xf32>
    %c17_58 = arith.constant 17 : index
    %249 = memref.load %arg0[%c17_58] : memref<81xf32, #tpu.memory_space<smem>>
    %250 = vector.broadcast %249 : f32 to vector<4x128xf32>
    %251 = arith.mulf %248, %250 : vector<4x128xf32>
    %252 = arith.addf %238, %251 : vector<4x128xf32>
    %c44 = arith.constant 44 : index
    %253 = memref.load %arg0[%c44] : memref<81xf32, #tpu.memory_space<smem>>
    %254 = vector.broadcast %253 : f32 to vector<4x128xf32>
    %255 = arith.mulf %248, %254 : vector<4x128xf32>
    %256 = arith.addf %242, %255 : vector<4x128xf32>
    %c71 = arith.constant 71 : index
    %257 = memref.load %arg0[%c71] : memref<81xf32, #tpu.memory_space<smem>>
    %258 = vector.broadcast %257 : f32 to vector<4x128xf32>
    %259 = arith.mulf %248, %258 : vector<4x128xf32>
    %260 = arith.addf %246, %259 : vector<4x128xf32>
    %c18 = arith.constant 18 : index
    %c0_59 = arith.constant 0 : index
    %c0_60 = arith.constant 0 : index
    %261 = vector.load %arg2[%c18, %c0_59, %c0_60] : memref<27x4x128xf32, #tpu.memory_space<vmem>>, vector<1x4x128xf32>
    %262 = vector.shape_cast %261 : vector<1x4x128xf32> to vector<4x128xf32>
    %c18_61 = arith.constant 18 : index
    %263 = memref.load %arg0[%c18_61] : memref<81xf32, #tpu.memory_space<smem>>
    %264 = vector.broadcast %263 : f32 to vector<4x128xf32>
    %265 = arith.mulf %262, %264 : vector<4x128xf32>
    %266 = arith.addf %252, %265 : vector<4x128xf32>
    %c45 = arith.constant 45 : index
    %267 = memref.load %arg0[%c45] : memref<81xf32, #tpu.memory_space<smem>>
    %268 = vector.broadcast %267 : f32 to vector<4x128xf32>
    %269 = arith.mulf %262, %268 : vector<4x128xf32>
    %270 = arith.addf %256, %269 : vector<4x128xf32>
    %c72 = arith.constant 72 : index
    %271 = memref.load %arg0[%c72] : memref<81xf32, #tpu.memory_space<smem>>
    %272 = vector.broadcast %271 : f32 to vector<4x128xf32>
    %273 = arith.mulf %262, %272 : vector<4x128xf32>
    %274 = arith.addf %260, %273 : vector<4x128xf32>
    %c19 = arith.constant 19 : index
    %c0_62 = arith.constant 0 : index
    %c0_63 = arith.constant 0 : index
    %275 = vector.load %arg2[%c19, %c0_62, %c0_63] : memref<27x4x128xf32, #tpu.memory_space<vmem>>, vector<1x4x128xf32>
    %276 = vector.shape_cast %275 : vector<1x4x128xf32> to vector<4x128xf32>
    %c19_64 = arith.constant 19 : index
    %277 = memref.load %arg0[%c19_64] : memref<81xf32, #tpu.memory_space<smem>>
    %278 = vector.broadcast %277 : f32 to vector<4x128xf32>
    %279 = arith.mulf %276, %278 : vector<4x128xf32>
    %280 = arith.addf %266, %279 : vector<4x128xf32>
    %c46 = arith.constant 46 : index
    %281 = memref.load %arg0[%c46] : memref<81xf32, #tpu.memory_space<smem>>
    %282 = vector.broadcast %281 : f32 to vector<4x128xf32>
    %283 = arith.mulf %276, %282 : vector<4x128xf32>
    %284 = arith.addf %270, %283 : vector<4x128xf32>
    %c73 = arith.constant 73 : index
    %285 = memref.load %arg0[%c73] : memref<81xf32, #tpu.memory_space<smem>>
    %286 = vector.broadcast %285 : f32 to vector<4x128xf32>
    %287 = arith.mulf %276, %286 : vector<4x128xf32>
    %288 = arith.addf %274, %287 : vector<4x128xf32>
    %c20 = arith.constant 20 : index
    %c0_65 = arith.constant 0 : index
    %c0_66 = arith.constant 0 : index
    %289 = vector.load %arg2[%c20, %c0_65, %c0_66] : memref<27x4x128xf32, #tpu.memory_space<vmem>>, vector<1x4x128xf32>
    %290 = vector.shape_cast %289 : vector<1x4x128xf32> to vector<4x128xf32>
    %c20_67 = arith.constant 20 : index
    %291 = memref.load %arg0[%c20_67] : memref<81xf32, #tpu.memory_space<smem>>
    %292 = vector.broadcast %291 : f32 to vector<4x128xf32>
    %293 = arith.mulf %290, %292 : vector<4x128xf32>
    %294 = arith.addf %280, %293 : vector<4x128xf32>
    %c47 = arith.constant 47 : index
    %295 = memref.load %arg0[%c47] : memref<81xf32, #tpu.memory_space<smem>>
    %296 = vector.broadcast %295 : f32 to vector<4x128xf32>
    %297 = arith.mulf %290, %296 : vector<4x128xf32>
    %298 = arith.addf %284, %297 : vector<4x128xf32>
    %c74 = arith.constant 74 : index
    %299 = memref.load %arg0[%c74] : memref<81xf32, #tpu.memory_space<smem>>
    %300 = vector.broadcast %299 : f32 to vector<4x128xf32>
    %301 = arith.mulf %290, %300 : vector<4x128xf32>
    %302 = arith.addf %288, %301 : vector<4x128xf32>
    %c21 = arith.constant 21 : index
    %c0_68 = arith.constant 0 : index
    %c0_69 = arith.constant 0 : index
    %303 = vector.load %arg2[%c21, %c0_68, %c0_69] : memref<27x4x128xf32, #tpu.memory_space<vmem>>, vector<1x4x128xf32>
    %304 = vector.shape_cast %303 : vector<1x4x128xf32> to vector<4x128xf32>
    %c21_70 = arith.constant 21 : index
    %305 = memref.load %arg0[%c21_70] : memref<81xf32, #tpu.memory_space<smem>>
    %306 = vector.broadcast %305 : f32 to vector<4x128xf32>
    %307 = arith.mulf %304, %306 : vector<4x128xf32>
    %308 = arith.addf %294, %307 : vector<4x128xf32>
    %c48 = arith.constant 48 : index
    %309 = memref.load %arg0[%c48] : memref<81xf32, #tpu.memory_space<smem>>
    %310 = vector.broadcast %309 : f32 to vector<4x128xf32>
    %311 = arith.mulf %304, %310 : vector<4x128xf32>
    %312 = arith.addf %298, %311 : vector<4x128xf32>
    %c75 = arith.constant 75 : index
    %313 = memref.load %arg0[%c75] : memref<81xf32, #tpu.memory_space<smem>>
    %314 = vector.broadcast %313 : f32 to vector<4x128xf32>
    %315 = arith.mulf %304, %314 : vector<4x128xf32>
    %316 = arith.addf %302, %315 : vector<4x128xf32>
    %c22 = arith.constant 22 : index
    %c0_71 = arith.constant 0 : index
    %c0_72 = arith.constant 0 : index
    %317 = vector.load %arg2[%c22, %c0_71, %c0_72] : memref<27x4x128xf32, #tpu.memory_space<vmem>>, vector<1x4x128xf32>
    %318 = vector.shape_cast %317 : vector<1x4x128xf32> to vector<4x128xf32>
    %c22_73 = arith.constant 22 : index
    %319 = memref.load %arg0[%c22_73] : memref<81xf32, #tpu.memory_space<smem>>
    %320 = vector.broadcast %319 : f32 to vector<4x128xf32>
    %321 = arith.mulf %318, %320 : vector<4x128xf32>
    %322 = arith.addf %308, %321 : vector<4x128xf32>
    %c49 = arith.constant 49 : index
    %323 = memref.load %arg0[%c49] : memref<81xf32, #tpu.memory_space<smem>>
    %324 = vector.broadcast %323 : f32 to vector<4x128xf32>
    %325 = arith.mulf %318, %324 : vector<4x128xf32>
    %326 = arith.addf %312, %325 : vector<4x128xf32>
    %c76 = arith.constant 76 : index
    %327 = memref.load %arg0[%c76] : memref<81xf32, #tpu.memory_space<smem>>
    %328 = vector.broadcast %327 : f32 to vector<4x128xf32>
    %329 = arith.mulf %318, %328 : vector<4x128xf32>
    %330 = arith.addf %316, %329 : vector<4x128xf32>
    %c23 = arith.constant 23 : index
    %c0_74 = arith.constant 0 : index
    %c0_75 = arith.constant 0 : index
    %331 = vector.load %arg2[%c23, %c0_74, %c0_75] : memref<27x4x128xf32, #tpu.memory_space<vmem>>, vector<1x4x128xf32>
    %332 = vector.shape_cast %331 : vector<1x4x128xf32> to vector<4x128xf32>
    %c23_76 = arith.constant 23 : index
    %333 = memref.load %arg0[%c23_76] : memref<81xf32, #tpu.memory_space<smem>>
    %334 = vector.broadcast %333 : f32 to vector<4x128xf32>
    %335 = arith.mulf %332, %334 : vector<4x128xf32>
    %336 = arith.addf %322, %335 : vector<4x128xf32>
    %c50 = arith.constant 50 : index
    %337 = memref.load %arg0[%c50] : memref<81xf32, #tpu.memory_space<smem>>
    %338 = vector.broadcast %337 : f32 to vector<4x128xf32>
    %339 = arith.mulf %332, %338 : vector<4x128xf32>
    %340 = arith.addf %326, %339 : vector<4x128xf32>
    %c77 = arith.constant 77 : index
    %341 = memref.load %arg0[%c77] : memref<81xf32, #tpu.memory_space<smem>>
    %342 = vector.broadcast %341 : f32 to vector<4x128xf32>
    %343 = arith.mulf %332, %342 : vector<4x128xf32>
    %344 = arith.addf %330, %343 : vector<4x128xf32>
    %c24 = arith.constant 24 : index
    %c0_77 = arith.constant 0 : index
    %c0_78 = arith.constant 0 : index
    %345 = vector.load %arg2[%c24, %c0_77, %c0_78] : memref<27x4x128xf32, #tpu.memory_space<vmem>>, vector<1x4x128xf32>
    %346 = vector.shape_cast %345 : vector<1x4x128xf32> to vector<4x128xf32>
    %c24_79 = arith.constant 24 : index
    %347 = memref.load %arg0[%c24_79] : memref<81xf32, #tpu.memory_space<smem>>
    %348 = vector.broadcast %347 : f32 to vector<4x128xf32>
    %349 = arith.mulf %346, %348 : vector<4x128xf32>
    %350 = arith.addf %336, %349 : vector<4x128xf32>
    %c51 = arith.constant 51 : index
    %351 = memref.load %arg0[%c51] : memref<81xf32, #tpu.memory_space<smem>>
    %352 = vector.broadcast %351 : f32 to vector<4x128xf32>
    %353 = arith.mulf %346, %352 : vector<4x128xf32>
    %354 = arith.addf %340, %353 : vector<4x128xf32>
    %c78 = arith.constant 78 : index
    %355 = memref.load %arg0[%c78] : memref<81xf32, #tpu.memory_space<smem>>
    %356 = vector.broadcast %355 : f32 to vector<4x128xf32>
    %357 = arith.mulf %346, %356 : vector<4x128xf32>
    %358 = arith.addf %344, %357 : vector<4x128xf32>
    %c25 = arith.constant 25 : index
    %c0_80 = arith.constant 0 : index
    %c0_81 = arith.constant 0 : index
    %359 = vector.load %arg2[%c25, %c0_80, %c0_81] : memref<27x4x128xf32, #tpu.memory_space<vmem>>, vector<1x4x128xf32>
    %360 = vector.shape_cast %359 : vector<1x4x128xf32> to vector<4x128xf32>
    %c25_82 = arith.constant 25 : index
    %361 = memref.load %arg0[%c25_82] : memref<81xf32, #tpu.memory_space<smem>>
    %362 = vector.broadcast %361 : f32 to vector<4x128xf32>
    %363 = arith.mulf %360, %362 : vector<4x128xf32>
    %364 = arith.addf %350, %363 : vector<4x128xf32>
    %c52 = arith.constant 52 : index
    %365 = memref.load %arg0[%c52] : memref<81xf32, #tpu.memory_space<smem>>
    %366 = vector.broadcast %365 : f32 to vector<4x128xf32>
    %367 = arith.mulf %360, %366 : vector<4x128xf32>
    %368 = arith.addf %354, %367 : vector<4x128xf32>
    %c79 = arith.constant 79 : index
    %369 = memref.load %arg0[%c79] : memref<81xf32, #tpu.memory_space<smem>>
    %370 = vector.broadcast %369 : f32 to vector<4x128xf32>
    %371 = arith.mulf %360, %370 : vector<4x128xf32>
    %372 = arith.addf %358, %371 : vector<4x128xf32>
    %c26 = arith.constant 26 : index
    %c0_83 = arith.constant 0 : index
    %c0_84 = arith.constant 0 : index
    %373 = vector.load %arg2[%c26, %c0_83, %c0_84] : memref<27x4x128xf32, #tpu.memory_space<vmem>>, vector<1x4x128xf32>
    %374 = vector.shape_cast %373 : vector<1x4x128xf32> to vector<4x128xf32>
    %c26_85 = arith.constant 26 : index
    %375 = memref.load %arg0[%c26_85] : memref<81xf32, #tpu.memory_space<smem>>
    %376 = vector.broadcast %375 : f32 to vector<4x128xf32>
    %377 = arith.mulf %374, %376 : vector<4x128xf32>
    %378 = arith.addf %364, %377 : vector<4x128xf32>
    %c53 = arith.constant 53 : index
    %379 = memref.load %arg0[%c53] : memref<81xf32, #tpu.memory_space<smem>>
    %380 = vector.broadcast %379 : f32 to vector<4x128xf32>
    %381 = arith.mulf %374, %380 : vector<4x128xf32>
    %382 = arith.addf %368, %381 : vector<4x128xf32>
    %c80 = arith.constant 80 : index
    %383 = memref.load %arg0[%c80] : memref<81xf32, #tpu.memory_space<smem>>
    %384 = vector.broadcast %383 : f32 to vector<4x128xf32>
    %385 = arith.mulf %374, %384 : vector<4x128xf32>
    %386 = arith.addf %372, %385 : vector<4x128xf32>
    %cst_86 = arith.constant 0.000000e+00 : f32
    %cst_87 = arith.constant 6.000000e+00 : f32
    %387 = vector.broadcast %cst_86 : f32 to vector<4x128xf32>
    %388 = arith.maximumf %387, %378 : vector<4x128xf32>
    %389 = vector.broadcast %cst_87 : f32 to vector<4x128xf32>
    %390 = arith.minimumf %389, %388 : vector<4x128xf32>
    %cst_88 = arith.constant 3.000000e+00 : f32
    %391 = vector.broadcast %cst_88 : f32 to vector<4x128xf32>
    %392 = arith.subf %390, %391 : vector<4x128xf32>
    %cst_89 = arith.constant 0.000000e+00 : f32
    %393 = vector.broadcast %cst_89 : f32 to vector<4x128xf32>
    %394 = arith.maximumf %392, %393 : vector<4x128xf32>
    %395 = arith.mulf %390, %394 : vector<4x128xf32>
    %cst_90 = arith.constant 0.166666672 : f32
    %396 = vector.broadcast %cst_90 : f32 to vector<4x128xf32>
    %397 = arith.mulf %395, %396 : vector<4x128xf32>
    %c0_91 = arith.constant 0 : index
    %c0_92 = arith.constant 0 : index
    %c0_93 = arith.constant 0 : index
    %398 = vector.load %arg3[%c0_91, %c0_92, %c0_93] : memref<3x4x128xf32, #tpu.memory_space<vmem>>, vector<1x4x128xf32>
    %399 = vector.shape_cast %398 : vector<1x4x128xf32> to vector<4x128xf32>
    %400 = vector.shape_cast %397 : vector<4x128xf32> to vector<1x4x128xf32>
    tpu.vector_store %arg3[%c0_91, %c0_92, %c0_93], %400 {strides = array<i32>} : memref<3x4x128xf32, #tpu.memory_space<vmem>>, vector<1x4x128xf32>,
    %cst_94 = arith.constant 0.000000e+00 : f32
    %cst_95 = arith.constant 6.000000e+00 : f32
    %401 = vector.broadcast %cst_94 : f32 to vector<4x128xf32>
    %402 = arith.maximumf %401, %382 : vector<4x128xf32>
    %403 = vector.broadcast %cst_95 : f32 to vector<4x128xf32>
    %404 = arith.minimumf %403, %402 : vector<4x128xf32>
    %cst_96 = arith.constant 3.000000e+00 : f32
    %405 = vector.broadcast %cst_96 : f32 to vector<4x128xf32>
    %406 = arith.subf %404, %405 : vector<4x128xf32>
    %cst_97 = arith.constant 0.000000e+00 : f32
    %407 = vector.broadcast %cst_97 : f32 to vector<4x128xf32>
    %408 = arith.maximumf %406, %407 : vector<4x128xf32>
    %409 = arith.mulf %404, %408 : vector<4x128xf32>
    %cst_98 = arith.constant 0.166666672 : f32
    %410 = vector.broadcast %cst_98 : f32 to vector<4x128xf32>
    %411 = arith.mulf %409, %410 : vector<4x128xf32>
    %c1_99 = arith.constant 1 : index
    %c0_100 = arith.constant 0 : index
    %c0_101 = arith.constant 0 : index
    %412 = vector.load %arg3[%c1_99, %c0_100, %c0_101] : memref<3x4x128xf32, #tpu.memory_space<vmem>>, vector<1x4x128xf32>
    %413 = vector.shape_cast %412 : vector<1x4x128xf32> to vector<4x128xf32>
    %414 = vector.shape_cast %411 : vector<4x128xf32> to vector<1x4x128xf32>
    tpu.vector_store %arg3[%c1_99, %c0_100, %c0_101], %414 {strides = array<i32>} : memref<3x4x128xf32, #tpu.memory_space<vmem>>, vector<1x4x128xf32>,
    %cst_102 = arith.constant 0.000000e+00 : f32
    %cst_103 = arith.constant 6.000000e+00 : f32
    %415 = vector.broadcast %cst_102 : f32 to vector<4x128xf32>
    %416 = arith.maximumf %415, %386 : vector<4x128xf32>
    %417 = vector.broadcast %cst_103 : f32 to vector<4x128xf32>
    %418 = arith.minimumf %417, %416 : vector<4x128xf32>
    %cst_104 = arith.constant 3.000000e+00 : f32
    %419 = vector.broadcast %cst_104 : f32 to vector<4x128xf32>
    %420 = arith.subf %418, %419 : vector<4x128xf32>
    %cst_105 = arith.constant 0.000000e+00 : f32
    %421 = vector.broadcast %cst_105 : f32 to vector<4x128xf32>
    %422 = arith.maximumf %420, %421 : vector<4x128xf32>
    %423 = arith.mulf %418, %422 : vector<4x128xf32>
    %cst_106 = arith.constant 0.166666672 : f32
    %424 = vector.broadcast %cst_106 : f32 to vector<4x128xf32>
    %425 = arith.mulf %423, %424 : vector<4x128xf32>
    %c2_107 = arith.constant 2 : index
    %c0_108 = arith.constant 0 : index
    %c0_109 = arith.constant 0 : index
    %426 = vector.load %arg3[%c2_107, %c0_108, %c0_109] : memref<3x4x128xf32, #tpu.memory_space<vmem>>, vector<1x4x128xf32>
    %427 = vector.shape_cast %426 : vector<1x4x128xf32> to vector<4x128xf32>
    %428 = vector.shape_cast %425 : vector<4x128xf32> to vector<1x4x128xf32>
    tpu.vector_store %arg3[%c2_107, %c0_108, %c0_109], %428 {strides = array<i32>} : memref<3x4x128xf32, #tpu.memory_space<vmem>>, vector<1x4x128xf32>,
    return
  }
}

</mosaic_0001>

<bundles_post_ra>
// kernel: tpu_custom_call.1
= control target key start
LH: loop header
LB: loop body
LE: loop exit
PB: predicated region body
PF: predicated region fallthrough
CT: control target
= control target key end

     0   :  { %8 = vsyncpa [#allocation5], 0  ;;  %s950_s0 = inlined_call_operand.hbm [shape: f32[81], index: 0, kind: input, shape index: {}]   ;;  %s951_s1 = inlined_call_operand.vmem [shape: f32[3], index: 1, kind: input, shape index: {}]   ;;  %s952_s2 = inlined_call_operand.hbm [shape: f32[27,4,128], index: 2, kind: input, shape index: {}]   ;;  %s953_s3 = inlined_call_operand.hbm [shape: f32[3,4,128], index: 3, kind: output, shape index: {}]  }
   0x1   :  { %9 = vsyncpa [#allocation6], 0 }
   0x2   :  { %10 = vsyncpa [#allocation3], 0 }
   0x3   :  { %11 = vsyncpa [#allocation4], 0  ;;  %s26_s14 = sshll.u32 %s951_s1, 4  ;;  %s571_s17 = scalar_lea.hbm %s950_s0, 16  ;;  %s27_s14 = int_to_ptr.vmem [resolvable:$true] %s26_s14 }
   0x4   :  { %p572_p0 = scmp.ne.s32.totalorder %s950_s0, %s571_s17  ;;  %p575_p1 = scmp.lt.u32.totalorder %s571_s17, %s950_s0 }
   0x6   :  { %p577_p2 = pnand %p575_p1, %p572_p0 }
   0x8   :  { %580 = shalt.err (!%p577_p2)
}
   0x9   :  { %s645_s22 = smov [#allocation2]   ;;  %s581_s1 = scalar_lea.vmem %s27_s14, 16 }
   0xa   :  { %19 = dma.hbm_to_smem %s950_s0, 16, %s645_s22, [#allocation5]  }
   0xb   :  { %p582_p3 = scmp.ne.s32.totalorder %s27_s14, %s581_s1  ;;  %p586_p4 = scmp.lt.s32.totalorder %s27_s14, %s27_s14 }
   0xc   :  { %p587_p5 = scmp.lt.s32.totalorder %s581_s1, %s581_s1 }
   0xe   :  { %p588_p6 = por %p587_p5, %p586_p4 }
  0x10   :  { %p589_p7 = pnand %p588_p6, %p582_p3 }
  0x12   :  { %592 = shalt.err (!%p589_p7)
}
  0x13   :  { %s646_s25 = smov [#allocation7]   ;;  %s647_s26 = smov [#allocation8]  }
  0x14   :  { %29 = dma.vmem_to_smem %s27_s14, 16, %s646_s25, [#allocation6]  }
  0x15   :  { %s35_s27 = sshll.u32 %s647_s26, 4  ;;  %s593_s30 = scalar_lea.hbm %s952_s2, 1728  ;;  %s36_s27 = int_to_ptr.vmem [resolvable:$true] %s35_s27 }
  0x16   :  { %p594_p8 = scmp.ne.s32.totalorder %s952_s2, %s593_s30  ;;  %p597_p9 = scmp.lt.u32.totalorder %s593_s30, %s952_s2 }
  0x18   :  { %p599_p10 = pnand %p597_p9, %p594_p8 }
  0x1a   :  { %602 = shalt.err (!%p599_p10)
}
  0x1b   :  { %s603_s7 = scalar_lea.vmem %s36_s27, 1728  ;;  %p608_p12 = scmp.lt.s32.totalorder %s36_s27, %s36_s27 }
  0x1c   :  { %p604_p11 = scmp.ne.s32.totalorder %s36_s27, %s603_s7  ;;  %p609_p13 = scmp.lt.s32.totalorder %s603_s7, %s603_s7 }
  0x1e   :  { %p610_p0 = por %p609_p13, %p608_p12 }
  0x20   :  { %p611_p1 = pnand %p610_p0, %p604_p11 }
  0x22   :  { %614 = shalt.err (!%p611_p1)
}
  0x23   :  { %s648_s8 = smov 64   ;;  %s649_s9 = smov 4  }
  0x24   :  { %41 = dma.hbm_to_vmem [thread:$0]  %s952_s2, 1728, %s36_s27, [#allocation3], %s648_s8, %s648_s8, %s649_s9  }
  0x25   :  { %637 = dma.done.wait [#allocation5], 16  }
  0x26   :  { %638 = vsyncadd [#allocation5], 4294967280 }
  0x27   :  { %639 = dma.done.wait [#allocation6], 16  }
  0x28   :  { %640 = vsyncadd [#allocation6], 4294967280 }
  0x29   :  { %641 = dma.done.wait [#allocation3], 1728  }
  0x2a   :  { %642 = vsyncadd [#allocation3], 4294965568 }
  0x2b   :  { %51 = sfence }
  0x2c   :  { %s52_s12 = sld [smem:[#allocation7]]  ;;  %s480_s13 = sld [smem:[#allocation7 + $0x1]]  ;;  %v61_v0 = vld [vmem:[#allocation8] sm:$0xf]  ;;  %v75_v2 = vld [vmem:[#allocation8 + $0x4] sm:$0xf] }
  0x2d   :  { %s701_s14 = sld [smem:[#allocation7 + $0x2]]  ;;  %s62_s15 = sld [smem:[#allocation2]]  ;;  %v89_v15 = vld [vmem:[#allocation8 + $0x8] sm:$0xf]  ;;  %v103_v24 = vld [vmem:[#allocation8 + $0xc] sm:$0xf] }
  0x2e   :  { %s482_s16 = sld [smem:[#allocation2 + $0x1b]]  ;;  %s483_s17 = sld [smem:[#allocation2 + $0x36]]  ;;  %v117_v33 = vld [vmem:[#allocation8 + $0x10] sm:$0xf]  ;;  %v131_v42 = vld [vmem:[#allocation8 + $0x14] sm:$0xf] }
  0x2f   :  { %s484_s18 = sld [smem:[#allocation2 + $0x1]]  ;;  %s703_s19 = sld [smem:[#allocation2 + $0x1c]]  ;;  %v145_v51 = vld [vmem:[#allocation8 + $0x18] sm:$0xf] }
  0x30   :  { %s705_s20 = sld [smem:[#allocation2 + $0x37]]  ;;  %s707_s2 = sld [smem:[#allocation2 + $0x2]] }
  0x31   :  { %s709_s21 = sld [smem:[#allocation2 + $0x1d]]  ;;  %s711_s22 = sld [smem:[#allocation2 + $0x38]] }
  0x32   :  { %s53_s23 = sadd.f32 5.0, %s52_s12  ;;  %s713_s24 = sld [smem:[#allocation2 + $0x3]] }
  0x33   :  { %s56_s1 = sadd.f32 5.0, %s480_s13  ;;  %v63_v1 = vstv %s62_s15  ;;  %s715_s25 = sld [smem:[#allocation2 + $0x1e]] }
  0x34   :  { %v54_v3 = vstv %s53_s23  ;;  %s59_s26 = sadd.f32 5.0, %s701_s14  ;;  %v64_v4 = vmul.f32 %v63_v1, %v61_v0  ;;  %v67_v5 = vstv %s482_s16  ;;  %v71_v6 = vstv %s483_s17  ;;  %s718_s27 = sld [smem:[#allocation2 + $0x39]] }
  0x35   :  { %v57_v7 = vstv %s56_s1  ;;  %v68_v8 = vmul.f32 %v67_v5, %v61_v0  ;;  %v72_v9 = vmul.f32 %v71_v6, %v61_v0  ;;  %v77_v10 = vstv %s484_s18  ;;  %s720_s28 = sld [smem:[#allocation2 + $0x4]]  ;;  %s722_s29 = sld [smem:[#allocation2 + $0x1f]]  ;;  %v159_v0 = vld [vmem:[#allocation8 + $0x1c] sm:$0xf] }
  0x36   :  { %v60_v11 = vstv %s59_s26  ;;  %v65_v12 = vadd.f32 %v64_v4, %v54_v3  ;;  %v78_v13 = vmul.f32 %v77_v10, %v75_v2  ;;  %v81_v14 = vstv %s703_s19  ;;  %s725_s30 = sld [smem:[#allocation2 + $0x3a]]  ;;  %s727_s4 = sld [smem:[#allocation2 + $0x5]] }
  0x37   :  { %v69_v16 = vadd.f32 %v68_v8, %v57_v7  ;;  %v73_v17 = vadd.f32 %v72_v9, %v60_v11  ;;  %v82_v18 = vmul.f32 %v81_v14, %v75_v2  ;;  %v85_v19 = vstv %s705_s20  ;;  %s730_s5 = sld [smem:[#allocation2 + $0x20]]  ;;  %s734_s0 = sld [smem:[#allocation2 + $0x3b]]  ;;  %v173_v9 = vld [vmem:[#allocation8 + $0x20] sm:$0xf] }
  0x38   :  { %v79_v20 = vadd.f32 %v78_v13, %v65_v12  ;;  %v86_v21 = vmul.f32 %v85_v19, %v75_v2  ;;  %v91_v22 = vstv %s707_s2  ;;  %v95_v23 = vstv %s709_s21  ;;  %s736_s6 = sld [smem:[#allocation2 + $0x6]]  ;;  %s739_s7 = sld [smem:[#allocation2 + $0x21]] }
  0x39   :  { %v83_v25 = vadd.f32 %v82_v18, %v69_v16  ;;  %v92_v26 = vmul.f32 %v91_v22, %v89_v15  ;;  %v96_v27 = vmul.f32 %v95_v23, %v89_v15  ;;  %v99_v28 = vstv %s711_s22  ;;  %s743_s10 = sld [smem:[#allocation2 + $0x3c]]  ;;  %s745_s11 = sld [smem:[#allocation2 + $0x7]]  ;;  %v187_v22 = vld [vmem:[#allocation8 + $0x24] sm:$0xf] }
  0x3a   :  { %v87_v29 = vadd.f32 %v86_v21, %v73_v17  ;;  %v100_v30 = vmul.f32 %v99_v28, %v89_v15  ;;  %v105_v31 = vstv %s713_s24  ;;  %v109_v32 = vstv %s715_s25  ;;  %s747_s12 = sld [smem:[#allocation2 + $0x22]]  ;;  %s752_s13 = sld [smem:[#allocation2 + $0x3d]] }
  0x3b   :  { %v93_v34 = vadd.f32 %v92_v26, %v79_v20  ;;  %v97_v35 = vadd.f32 %v96_v27, %v83_v25  ;;  %v106_v36 = vmul.f32 %v105_v31, %v103_v24  ;;  %v110_v37 = vmul.f32 %v109_v32, %v103_v24  ;;  %s754_s14 = sld [smem:[#allocation2 + $0x8]]  ;;  %s759_s15 = sld [smem:[#allocation2 + $0x23]]  ;;  %v201_v31 = vld [vmem:[#allocation8 + $0x28] sm:$0xf] }
  0x3c   :  { %v101_v38 = vadd.f32 %v100_v30, %v87_v29  ;;  %v113_v39 = vstv %s718_s27  ;;  %v119_v40 = vstv %s720_s28  ;;  %v123_v41 = vstv %s722_s29  ;;  %s761_s16 = sld [smem:[#allocation2 + $0x3e]]  ;;  %s763_s17 = sld [smem:[#allocation2 + $0x9]] }
  0x3d   :  { %v107_v43 = vadd.f32 %v106_v36, %v93_v34  ;;  %v111_v44 = vadd.f32 %v110_v37, %v97_v35  ;;  %v114_v45 = vmul.f32 %v113_v39, %v103_v24  ;;  %v120_v46 = vmul.f32 %v119_v40, %v117_v33  ;;  %s767_s18 = sld [smem:[#allocation2 + $0x24]]  ;;  %s769_s19 = sld [smem:[#allocation2 + $0x3f]]  ;;  %v215_v40 = vld [vmem:[#allocation8 + $0x2c] sm:$0xf] }
  0x3e   :  { %v124_v47 = vmul.f32 %v123_v41, %v117_v33  ;;  %v127_v48 = vstv %s725_s30  ;;  %v133_v49 = vstv %s727_s4  ;;  %v137_v50 = vstv %s730_s5  ;;  %s771_s20 = sld [smem:[#allocation2 + $0xa]]  ;;  %s776_s2 = sld [smem:[#allocation2 + $0x25]] }
  0x3f   :  { %v115_v52 = vadd.f32 %v114_v45, %v101_v38  ;;  %v121_v53 = vadd.f32 %v120_v46, %v107_v43  ;;  %v128_v54 = vmul.f32 %v127_v48, %v117_v33  ;;  %v134_v55 = vmul.f32 %v133_v49, %v131_v42  ;;  %s778_s21 = sld [smem:[#allocation2 + $0x40]]  ;;  %s783_s22 = sld [smem:[#allocation2 + $0xb]]  ;;  %v229_v49 = vld [vmem:[#allocation8 + $0x30] sm:$0xf] }
  0x40   :  { %v125_v56 = vadd.f32 %v124_v47, %v111_v44  ;;  %v138_v57 = vmul.f32 %v137_v50, %v131_v42  ;;  %v141_v58 = vstv %s734_s0  ;;  %v147_v59 = vstv %s736_s6  ;;  %s785_s23 = sld [smem:[#allocation2 + $0x26]]  ;;  %s787_s24 = sld [smem:[#allocation2 + $0x41]] }
  0x41   :  { %v129_v60 = vadd.f32 %v128_v54, %v115_v52  ;;  %v135_v61 = vadd.f32 %v134_v55, %v121_v53  ;;  %v142_v62 = vmul.f32 %v141_v58, %v131_v42  ;;  %v148_v63 = vmul.f32 %v147_v59, %v145_v51  ;;  %s791_s1 = sld [smem:[#allocation2 + $0xc]]  ;;  %s793_s25 = sld [smem:[#allocation2 + $0x27]]  ;;  %v243_v58 = vld [vmem:[#allocation8 + $0x34] sm:$0xf] }
  0x42   :  { %v139_v1 = vadd.f32 %v138_v57, %v125_v56  ;;  %v151_v2 = vstv %s739_s7  ;;  %v155_v3 = vstv %s743_s10  ;;  %v161_v4 = vstv %s745_s11  ;;  %s795_s26 = sld [smem:[#allocation2 + $0x42]]  ;;  %s800_s27 = sld [smem:[#allocation2 + $0xd]] }
  0x43   :  { %v143_v5 = vadd.f32 %v142_v62, %v129_v60  ;;  %v149_v6 = vadd.f32 %v148_v63, %v135_v61  ;;  %v152_v7 = vmul.f32 %v151_v2, %v145_v51  ;;  %v156_v8 = vmul.f32 %v155_v3, %v145_v51  ;;  %s802_s28 = sld [smem:[#allocation2 + $0x28]]  ;;  %s807_s29 = sld [smem:[#allocation2 + $0x43]]  ;;  %v257_v3 = vld [vmem:[#allocation8 + $0x38] sm:$0xf] }
  0x44   :  { %v162_v10 = vmul.f32 %v161_v4, %v159_v0  ;;  %v165_v11 = vstv %s747_s12  ;;  %v169_v12 = vstv %s752_s13  ;;  %v175_v13 = vstv %s754_s14  ;;  %s809_s30 = sld [smem:[#allocation2 + $0xe]]  ;;  %s811_s4 = sld [smem:[#allocation2 + $0x29]] }
  0x45   :  { %v153_v14 = vadd.f32 %v152_v7, %v139_v1  ;;  %v157_v15 = vadd.f32 %v156_v8, %v143_v5  ;;  %v166_v16 = vmul.f32 %v165_v11, %v159_v0  ;;  %v170_v17 = vmul.f32 %v169_v12, %v159_v0  ;;  %s815_s5 = sld [smem:[#allocation2 + $0x44]]  ;;  %s817_s0 = sld [smem:[#allocation2 + $0xf]] }
  0x46   :  { %v163_v18 = vadd.f32 %v162_v10, %v149_v6  ;;  %v176_v19 = vmul.f32 %v175_v13, %v173_v9  ;;  %v179_v20 = vstv %s759_s15  ;;  %v183_v21 = vstv %s761_s16  ;;  %s819_s6 = sld [smem:[#allocation2 + $0x2a]]  ;;  %s824_s7 = sld [smem:[#allocation2 + $0x45]] }
  0x47   :  { %v167_v23 = vadd.f32 %v166_v16, %v153_v14  ;;  %v171_v24 = vadd.f32 %v170_v17, %v157_v15  ;;  %v180_v25 = vmul.f32 %v179_v20, %v173_v9  ;;  %v184_v26 = vmul.f32 %v183_v21, %v173_v9  ;;  %s826_s10 = sld [smem:[#allocation2 + $0x10]]  ;;  %s831_s11 = sld [smem:[#allocation2 + $0x2b]]  ;;  %v271_v16 = vld [vmem:[#allocation8 + $0x3c] sm:$0xf] }
  0x48   :  { %v177_v27 = vadd.f32 %v176_v19, %v163_v18  ;;  %v189_v28 = vstv %s763_s17  ;;  %v193_v29 = vstv %s767_s18  ;;  %v197_v30 = vstv %s769_s19  ;;  %s833_s12 = sld [smem:[#allocation2 + $0x46]]  ;;  %s835_s13 = sld [smem:[#allocation2 + $0x11]] }
  0x49   :  { %v181_v32 = vadd.f32 %v180_v25, %v167_v23  ;;  %v185_v33 = vadd.f32 %v184_v26, %v171_v24  ;;  %v190_v34 = vmul.f32 %v189_v28, %v187_v22  ;;  %v194_v35 = vmul.f32 %v193_v29, %v187_v22  ;;  %s839_s14 = sld [smem:[#allocation2 + $0x2c]]  ;;  %s841_s15 = sld [smem:[#allocation2 + $0x47]]  ;;  %v285_v25 = vld [vmem:[#allocation8 + $0x40] sm:$0xf] }
  0x4a   :  { %v198_v36 = vmul.f32 %v197_v30, %v187_v22  ;;  %v203_v37 = vstv %s771_s20  ;;  %v207_v38 = vstv %s776_s2  ;;  %v211_v39 = vstv %s778_s21  ;;  %s843_s16 = sld [smem:[#allocation2 + $0x12]]  ;;  %s848_s17 = sld [smem:[#allocation2 + $0x2d]] }
  0x4b   :  { %v191_v41 = vadd.f32 %v190_v34, %v177_v27  ;;  %v195_v42 = vadd.f32 %v194_v35, %v181_v32  ;;  %v204_v43 = vmul.f32 %v203_v37, %v201_v31  ;;  %v208_v44 = vmul.f32 %v207_v38, %v201_v31  ;;  %s850_s18 = sld [smem:[#allocation2 + $0x48]]  ;;  %s855_s19 = sld [smem:[#allocation2 + $0x13]]  ;;  %v299_v38 = vld [vmem:[#allocation8 + $0x44] sm:$0xf] }
  0x4c   :  { %v199_v45 = vadd.f32 %v198_v36, %v185_v33  ;;  %v212_v46 = vmul.f32 %v211_v39, %v201_v31  ;;  %v217_v47 = vstv %s783_s22  ;;  %v221_v48 = vstv %s785_s23  ;;  %s857_s20 = sld [smem:[#allocation2 + $0x2e]]  ;;  %s859_s2 = sld [smem:[#allocation2 + $0x49]] }
  0x4d   :  { %v205_v50 = vadd.f32 %v204_v43, %v191_v41  ;;  %v209_v51 = vadd.f32 %v208_v44, %v195_v42  ;;  %v218_v52 = vmul.f32 %v217_v47, %v215_v40  ;;  %v222_v53 = vmul.f32 %v221_v48, %v215_v40  ;;  %s863_s21 = sld [smem:[#allocation2 + $0x14]]  ;;  %s865_s22 = sld [smem:[#allocation2 + $0x2f]]  ;;  %v313_v47 = vld [vmem:[#allocation8 + $0x48] sm:$0xf] }
  0x4e   :  { %v213_v54 = vadd.f32 %v212_v46, %v199_v45  ;;  %v225_v55 = vstv %s787_s24  ;;  %v231_v56 = vstv %s791_s1  ;;  %v235_v57 = vstv %s793_s25  ;;  %s867_s23 = sld [smem:[#allocation2 + $0x4a]]  ;;  %s872_s24 = sld [smem:[#allocation2 + $0x15]] }
  0x4f   :  { %v219_v59 = vadd.f32 %v218_v52, %v205_v50  ;;  %v223_v60 = vadd.f32 %v222_v53, %v209_v51  ;;  %v226_v61 = vmul.f32 %v225_v55, %v215_v40  ;;  %v232_v62 = vmul.f32 %v231_v56, %v229_v49  ;;  %s874_s1 = sld [smem:[#allocation2 + $0x30]]  ;;  %v327_v56 = vld [vmem:[#allocation8 + $0x4c] sm:$0xf]  ;;  %s879_s25 = sld [smem:[#allocation2 + $0x4b]] }
  0x50   :  { %v236_v63 = vmul.f32 %v235_v57, %v229_v49  ;;  %v239_v0 = vstv %s795_s26  ;;  %v245_v1 = vstv %s800_s27  ;;  %v249_v2 = vstv %s802_s28  ;;  %s881_s26 = sld [smem:[#allocation2 + $0x16]]  ;;  %s883_s27 = sld [smem:[#allocation2 + $0x31]] }
  0x51   :  { %v227_v4 = vadd.f32 %v226_v61, %v213_v54  ;;  %v233_v5 = vadd.f32 %v232_v62, %v219_v59  ;;  %v240_v6 = vmul.f32 %v239_v0, %v229_v49  ;;  %v246_v7 = vmul.f32 %v245_v1, %v243_v58  ;;  %v341_v1 = vld [vmem:[#allocation8 + $0x50] sm:$0xf]  ;;  %s887_s28 = sld [smem:[#allocation2 + $0x4c]] }
  0x52   :  { %v237_v8 = vadd.f32 %v236_v63, %v223_v60  ;;  %v250_v9 = vmul.f32 %v249_v2, %v243_v58  ;;  %v253_v10 = vstv %s807_s29  ;;  %v259_v11 = vstv %s809_s30  ;;  %s889_s29 = sld [smem:[#allocation2 + $0x17]]  ;;  %s891_s30 = sld [smem:[#allocation2 + $0x32]] }
  0x53   :  { %v241_v12 = vadd.f32 %v240_v6, %v227_v4  ;;  %v247_v13 = vadd.f32 %v246_v7, %v233_v5  ;;  %v254_v14 = vmul.f32 %v253_v10, %v243_v58  ;;  %v260_v15 = vmul.f32 %v259_v11, %v257_v3  ;;  %v355_v10 = vld [vmem:[#allocation8 + $0x54] sm:$0xf] }
  0x54   :  { %v251_v17 = vadd.f32 %v250_v9, %v237_v8  ;;  %v263_v18 = vstv %s811_s4  ;;  %v267_v19 = vstv %s815_s5  ;;  %v273_v20 = vstv %s817_s0  ;;  %s896_s4 = sld [smem:[#allocation2 + $0x4d]]  ;;  %s898_s5 = sld [smem:[#allocation2 + $0x18]] }
  0x55   :  { %v255_v21 = vadd.f32 %v254_v14, %v241_v12  ;;  %v261_v22 = vadd.f32 %v260_v15, %v247_v13  ;;  %v264_v23 = vmul.f32 %v263_v18, %v257_v3  ;;  %v268_v24 = vmul.f32 %v267_v19, %v257_v3  ;;  %v369_v19 = vld [vmem:[#allocation8 + $0x58] sm:$0xf]  ;;  %s903_s0 = sld [smem:[#allocation2 + $0x33]] }
  0x56   :  { %v274_v26 = vmul.f32 %v273_v20, %v271_v16  ;;  %v277_v27 = vstv %s819_s6  ;;  %v281_v28 = vstv %s824_s7  ;;  %v287_v29 = vstv %s826_s10  ;;  %s905_s6 = sld [smem:[#allocation2 + $0x4e]]  ;;  %s907_s7 = sld [smem:[#allocation2 + $0x19]] }
  0x57   :  { %v265_v30 = vadd.f32 %v264_v23, %v251_v17  ;;  %v269_v31 = vadd.f32 %v268_v24, %v255_v21  ;;  %v278_v32 = vmul.f32 %v277_v27, %v271_v16  ;;  %v282_v33 = vmul.f32 %v281_v28, %v271_v16  ;;  %s911_s10 = sld [smem:[#allocation2 + $0x34]] }
  0x58   :  { %v275_v34 = vadd.f32 %v274_v26, %v261_v22  ;;  %v288_v35 = vmul.f32 %v287_v29, %v285_v25  ;;  %v291_v36 = vstv %s831_s11  ;;  %v295_v37 = vstv %s833_s12  ;;  %s913_s11 = sld [smem:[#allocation2 + $0x4f]]  ;;  %s915_s12 = sld [smem:[#allocation2 + $0x1a]] }
  0x59   :  { %v279_v39 = vadd.f32 %v278_v32, %v265_v30  ;;  %v283_v40 = vadd.f32 %v282_v33, %v269_v31  ;;  %v292_v41 = vmul.f32 %v291_v36, %v285_v25  ;;  %v296_v42 = vmul.f32 %v295_v37, %v285_v25  ;;  %v383_v32 = vld [vmem:[#allocation8 + $0x5c] sm:$0xf] }
  0x5a   :  { %v289_v43 = vadd.f32 %v288_v35, %v275_v34  ;;  %v301_v44 = vstv %s835_s13  ;;  %v305_v45 = vstv %s839_s14  ;;  %v309_v46 = vstv %s841_s15  ;;  %s920_s13 = sld [smem:[#allocation2 + $0x35]]  ;;  %s922_s14 = sld [smem:[#allocation2 + $0x50]] }
  0x5b   :  { %v293_v48 = vadd.f32 %v292_v41, %v279_v39  ;;  %v297_v49 = vadd.f32 %v296_v42, %v283_v40  ;;  %v302_v50 = vmul.f32 %v301_v44, %v299_v38  ;;  %v306_v51 = vmul.f32 %v305_v45, %v299_v38  ;;  %v397_v41 = vld [vmem:[#allocation8 + $0x60] sm:$0xf]  ;;  %s650_s15 = smov [#allocation9]  }
  0x5c   :  { %v310_v52 = vmul.f32 %v309_v46, %v299_v38  ;;  %v315_v53 = vstv %s843_s16  ;;  %v319_v54 = vstv %s848_s17  ;;  %v323_v55 = vstv %s850_s18  ;;  %s466_s16 = sshll.u32 %s650_s15, 4  ;;  %s467_s16 = int_to_ptr.vmem [resolvable:$true] %s466_s16 }
  0x5d   :  { %v303_v57 = vadd.f32 %v302_v50, %v289_v43  ;;  %v307_v58 = vadd.f32 %v306_v51, %v293_v48  ;;  %v316_v59 = vmul.f32 %v315_v53, %v313_v47  ;;  %v320_v60 = vmul.f32 %v319_v54, %v313_v47  ;;  %v411_v54 = vld [vmem:[#allocation8 + $0x64] sm:$0xf]  ;;  %s615_s17 = scalar_lea.vmem %s467_s16, 192  ;;  %p620_p3 = scmp.lt.s32.totalorder %s467_s16, %s467_s16 }
  0x5e   :  { %v311_v61 = vadd.f32 %v310_v52, %v297_v49  ;;  %v324_v62 = vmul.f32 %v323_v55, %v313_v47  ;;  %v329_v63 = vstv %s855_s19  ;;  %v333_v0 = vstv %s857_s20  ;;  %p616_p2 = scmp.ne.s32.totalorder %s467_s16, %s615_s17  ;;  %p621_p4 = scmp.lt.s32.totalorder %s615_s17, %s615_s17 }
  0x5f   :  { %v317_v2 = vadd.f32 %v316_v59, %v303_v57  ;;  %v321_v3 = vadd.f32 %v320_v60, %v307_v58  ;;  %v330_v4 = vmul.f32 %v329_v63, %v327_v56  ;;  %v334_v5 = vmul.f32 %v333_v0, %v327_v56  ;;  %v425_v63 = vld [vmem:[#allocation8 + $0x68] sm:$0xf] }
  0x60   :  { %v325_v6 = vadd.f32 %v324_v62, %v311_v61  ;;  %v337_v7 = vstv %s859_s2  ;;  %v343_v8 = vstv %s863_s21  ;;  %v347_v9 = vstv %s865_s22  ;;  %p622_p5 = por %p621_p4, %p620_p3 }
  0x61   :  { %v331_v11 = vadd.f32 %v330_v4, %v317_v2  ;;  %v335_v12 = vadd.f32 %v334_v5, %v321_v3  ;;  %v338_v13 = vmul.f32 %v337_v7, %v327_v56  ;;  %v344_v14 = vmul.f32 %v343_v8, %v341_v1 }
  0x62   :  { %v348_v15 = vmul.f32 %v347_v9, %v341_v1  ;;  %v351_v16 = vstv %s867_s23  ;;  %v357_v17 = vstv %s872_s24  ;;  %v361_v18 = vstv %s874_s1  ;;  %p623_p6 = pnand %p622_p5, %p616_p2 }
  0x63   :  { %v339_v20 = vadd.f32 %v338_v13, %v325_v6  ;;  %v345_v21 = vadd.f32 %v344_v14, %v331_v11  ;;  %v352_v22 = vmul.f32 %v351_v16, %v341_v1  ;;  %v358_v23 = vmul.f32 %v357_v17, %v355_v10 }
  0x64   :  { %v349_v24 = vadd.f32 %v348_v15, %v335_v12  ;;  %v362_v25 = vmul.f32 %v361_v18, %v355_v10  ;;  %v365_v26 = vstv %s879_s25  ;;  %v371_v27 = vstv %s881_s26 }
  0x65   :  { %v353_v28 = vadd.f32 %v352_v22, %v339_v20  ;;  %v359_v29 = vadd.f32 %v358_v23, %v345_v21  ;;  %v366_v30 = vmul.f32 %v365_v26, %v355_v10  ;;  %v372_v31 = vmul.f32 %v371_v27, %v369_v19 }
  0x66   :  { %v363_v33 = vadd.f32 %v362_v25, %v349_v24  ;;  %v375_v34 = vstv %s883_s27  ;;  %v379_v35 = vstv %s887_s28  ;;  %v385_v36 = vstv %s889_s29 }
  0x67   :  { %v367_v37 = vadd.f32 %v366_v30, %v353_v28  ;;  %v373_v38 = vadd.f32 %v372_v31, %v359_v29  ;;  %v376_v39 = vmul.f32 %v375_v34, %v369_v19  ;;  %v380_v40 = vmul.f32 %v379_v35, %v369_v19 }
  0x68   :  { %v386_v42 = vmul.f32 %v385_v36, %v383_v32  ;;  %v389_v43 = vstv %s891_s30  ;;  %v393_v44 = vstv %s896_s4  ;;  %v399_v45 = vstv %s898_s5 }
  0x69   :  { %v377_v46 = vadd.f32 %v376_v39, %v363_v33  ;;  %v381_v47 = vadd.f32 %v380_v40, %v367_v37  ;;  %v390_v48 = vmul.f32 %v389_v43, %v383_v32  ;;  %v394_v49 = vmul.f32 %v393_v44, %v383_v32 }
  0x6a   :  { %v387_v50 = vadd.f32 %v386_v42, %v373_v38  ;;  %v400_v51 = vmul.f32 %v399_v45, %v397_v41  ;;  %v403_v52 = vstv %s903_s0  ;;  %v407_v53 = vstv %s905_s6 }
  0x6b   :  { %v391_v55 = vadd.f32 %v390_v48, %v377_v46  ;;  %v395_v56 = vadd.f32 %v394_v49, %v381_v47  ;;  %v404_v57 = vmul.f32 %v403_v52, %v397_v41  ;;  %v408_v58 = vmul.f32 %v407_v53, %v397_v41 }
  0x6c   :  { %v401_v59 = vadd.f32 %v400_v51, %v387_v50  ;;  %v413_v60 = vstv %s907_s7  ;;  %v417_v61 = vstv %s911_s10  ;;  %v421_v62 = vstv %s913_s11 }
  0x6d   :  { %v405_v0 = vadd.f32 %v404_v57, %v391_v55  ;;  %v409_v1 = vadd.f32 %v408_v58, %v395_v56  ;;  %v414_v2 = vmul.f32 %v413_v60, %v411_v54  ;;  %v418_v3 = vmul.f32 %v417_v61, %v411_v54 }
  0x6e   :  { %v422_v4 = vmul.f32 %v421_v62, %v411_v54  ;;  %v427_v5 = vstv %s915_s12  ;;  %v431_v6 = vstv %s920_s13  ;;  %v435_v7 = vstv %s922_s14 }
  0x6f   :  { %v415_v8 = vadd.f32 %v414_v2, %v401_v59  ;;  %v419_v9 = vadd.f32 %v418_v3, %v405_v0  ;;  %v428_v10 = vmul.f32 %v427_v5, %v425_v63  ;;  %v432_v11 = vmul.f32 %v431_v6, %v425_v63 }
  0x70   :  { %v423_v12 = vadd.f32 %v422_v4, %v409_v1  ;;  %v436_v13 = vmul.f32 %v435_v7, %v425_v63 }
  0x71   :  { %v429_v14 = vadd.f32 %v428_v10, %v415_v8  ;;  %v433_v15 = vadd.f32 %v432_v11, %v419_v9 }
  0x72   :  { %v437_v16 = vadd.f32 %v436_v13, %v423_v12 }
  0x73   :  { %v438_v17 = vmax.f32 %v429_v14, 0.0  ;;  %v445_v18 = vmax.f32 %v433_v15, 0.0 }
  0x74   :  { %v453_v19 = vmax.f32 %v437_v16, 0.0 }
  0x75   :  { %v439_v20 = vmin.f32 %v438_v17, 6.0  ;;  %v446_v21 = vmin.f32 %v445_v18, 6.0 }
  0x76   :  { %v454_v22 = vmin.f32 %v453_v19, 6.0 }
  0x77   :  { %v562_v23 = vadd.f32 -3.0, %v439_v20  ;;  %v563_v24 = vadd.f32 -3.0, %v446_v21 }
  0x78   :  { %v564_v25 = vadd.f32 -3.0, %v454_v22 }
  0x79   :  { %v441_v26 = vmax.f32 %v562_v23, 0.0  ;;  %v448_v27 = vmax.f32 %v563_v24, 0.0 }
  0x7a   :  { %v456_v28 = vmax.f32 %v564_v25, 0.0 }
  0x7b   :  { %v442_v29 = vmul.f32 %v441_v26, %v439_v20  ;;  %v449_v30 = vmul.f32 %v448_v27, %v446_v21 }
  0x7c   :  { %v457_v31 = vmul.f32 %v456_v28, %v454_v22 }
  0x7d   :  { %v443_v32 = vmul.f32 0.16666667, %v442_v29  ;;  %v450_v33 = vmul.f32 0.16666667, %v449_v30 }
  0x7e   :  { %v458_v34 = vmul.f32 0.16666667, %v457_v31 }
  0x7f   :  { %444 = vst [vmem:[#allocation9] sm:$0xf] %v443_v32  ;;  %452 = vst [vmem:[#allocation9 + $0x4] sm:$0xf] %v450_v33 }
  0x80   :  { %460 = vst [vmem:[#allocation9 + $0x8] sm:$0xf] %v458_v34 }
  0x81   :  { %626 = shalt.err (!%p623_p6)
}
  0x82   :  { %s627_s20 = scalar_lea.hbm %s953_s3, 192 }
  0x83   :  { %p628_p7 = scmp.ne.s32.totalorder %s953_s3, %s627_s20  ;;  %p631_p8 = scmp.lt.u32.totalorder %s627_s20, %s953_s3 }
  0x85   :  { %p633_p9 = pnand %p631_p8, %p628_p7 }
  0x87   :  { %636 = shalt.err (!%p633_p9)
}
  0x88   :  { %472 = dma.vmem_to_hbm [thread:$0]  %s467_s16, 192, %s953_s3, [#allocation4], %s648_s8, %s648_s8, %s649_s9  }
  0x89   :  { %643 = dma.done.wait [#allocation4], 192  }
  0x8a   :  { %644 = vsyncadd [#allocation4], 4294967104 }
  0x8b   :  { %476 = vsyncpa [#allocation3], 1 }
  0x8c   :  { %477 = vsyncpa [#allocation4], 1 }
  0x8d   :  { %478 = vsyncpa [#allocation5], 1 }
  0x8e   :  { %479 = vsyncpa [#allocation6], 1 }

</bundles_post_ra>
